<compile_context>
chip_gen: v7x
topology: tpu7x:2x2x1
jax: 0.10.0
libtpu: 0.0.40
codegen_flags: <defaults>
</compile_context>

<pallas_src>
import functools

import jax
import jax.numpy as jnp
from jax.experimental import pallas as pl
from jax.experimental.pallas import tpu as pltpu

_LANE = 128
_SUB = 8
_CHUNK = _SUB * _LANE  # 1024 elements


def _accumulate_block(pred_ref, gt_ref, loss_ref, npos_ref, *,
                      sub_rows, n_sub, rows_left=None):
    """One fused pass over the current (block_rows, 128) block.

    Accumulates the merged (pos+neg) focal-loss partial and the num_pos
    partial into the resident (8, 128) output blocks.  When `rows_left`
    (dynamic scalar) is given, rows at/after it are neutralized (used only
    for the partial last block)."""

    @pl.loop(0, n_sub)
    def _(j):
        row0 = pl.multiple_of(j * sub_rows, sub_rows)
        pred = pred_ref[pl.ds(row0, sub_rows), :].astype(jnp.float32)
        gt = gt_ref[pl.ds(row0, sub_rows), :].astype(jnp.float32)

        is_pos = gt == 1.0
        pos_f = is_pos.astype(jnp.float32)
        one_m_gt = 1.0 - gt

        if rows_left is not None:
            # Partial last block only: zero the pos/neg weights of
            # out-of-range rows and keep the log argument finite.
            row_ids = jax.lax.broadcasted_iota(jnp.int32, pred.shape, 0)
            valid = row_ids < (rows_left - row0)
            validf = valid.astype(jnp.float32)
            pred = jnp.where(valid, pred, 0.5)
            pos_f = pos_f * validf
            one_m_gt = one_m_gt * validf

        one_m_pred = 1.0 - pred
        sq_gt = one_m_gt * one_m_gt
        neg_w = sq_gt * sq_gt                    # (1 - gt)^4; == 0 at gt == 1

        # One EUP log per element; pos/neg sites are disjoint.
        lg = jnp.log(jnp.where(is_pos, pred, one_m_pred))
        w = one_m_pred * one_m_pred * pos_f + pred * pred * neg_w
        loss = lg * w

        # (sub_rows, 128) -> (8, 128) via pure-VPU sublane folds.
        loss_ref[...] += jnp.sum(loss.reshape(-1, _SUB, _LANE), axis=0)
        npos_ref[...] += jnp.sum(pos_f.reshape(-1, _SUB, _LANE), axis=0)


def _focal_kernel(pred_ref, gt_ref, loss_ref, npos_ref, *,
                  rows, block_rows, sub_rows, num_i, ragged):
    i = pl.program_id(1)

    @pl.when(i == 0)
    def _():
        loss_ref[...] = jnp.zeros_like(loss_ref)
        npos_ref[...] = jnp.zeros_like(npos_ref)

    n_sub = block_rows // sub_rows
    acc = functools.partial(_accumulate_block, pred_ref, gt_ref,
                            loss_ref, npos_ref,
                            sub_rows=sub_rows, n_sub=n_sub)

    if ragged:
        c = pl.program_id(0)
        rows_left = rows - (c * num_i + i) * block_rows
        is_full = rows_left >= block_rows

        @pl.when(is_full)
        def _():
            acc()                        # hot path: no per-element mask

        @pl.when(jnp.logical_not(is_full))
        def _():
            acc(rows_left=rows_left)     # only the partial last block
    else:
        acc()


def focal_loss(pred, gt, *, tile_rows=4096, n_splits=2):
    """CornerNet modified focal loss.  pred, gt: (B, C, H, W), pred in (0, 1).

    Inputs may be f32 or bf16 (upcast happens on the in-VMEM block)."""
    assert pred.shape == gt.shape
    total = pred.size

    pred_flat = pred.reshape(-1)
    gt_flat = gt.reshape(-1)
    pad = (-total) % _CHUNK
    if pad:
        # Fallback for awkward element counts only; typical heatmap shapes
        # (multiple-of-1024 element counts) take the copy-free reshape path.
        # Zero padding is contribution-neutral: gt=0 -> not a positive,
        # pred=0 -> log(1-0)=0 and pred^2=0, so loss and num_pos both get 0.
        # TODO(synk): for huge non-1024-multiple inputs, split off the tail
        # and handle it in plain JAX instead of copying the whole array.
        pred_flat = jnp.pad(pred_flat, (0, pad))
        gt_flat = jnp.pad(gt_flat, (0, pad))

    rows = (total + pad) // _LANE          # always a multiple of 8
    pred2d = pred_flat.reshape(rows, _LANE)
    gt2d = gt_flat.reshape(rows, _LANE)

    block_rows = min(tile_rows, rows)      # multiple of 8
    num_blocks = pl.cdiv(rows, block_rows)
    # Keep the leading (megacore) split only when it divides the block count
    # exactly: no duplicate / clamped blocks, no wasted DMA+compute.
    if n_splits < 1 or num_blocks % n_splits != 0:
        n_splits = 1
    num_i = num_blocks // n_splits
    ragged = num_blocks * block_rows != rows   # partial last block?

    # Sub-chunk size for the fused in-block reduction loop: bounds vreg
    # pressure; must divide block_rows and be a multiple of 8.
    sub_rows = next(s for s in (64, 32, 16, 8) if block_rows % s == 0)

    kernel = functools.partial(_focal_kernel, rows=rows, block_rows=block_rows,
                               sub_rows=sub_rows, num_i=num_i, ragged=ragged)

    def in_idx(c, i):
        return (c * num_i + i, 0)

    out_spec = pl.BlockSpec((None, _SUB, _LANE), lambda c, i: (c, 0, 0))
    out_shape = jax.ShapeDtypeStruct((n_splits, _SUB, _LANE), jnp.float32)

    loss_p, npos_p = pl.pallas_call(
        kernel,
        out_shape=(out_shape, out_shape),
        grid_spec=pltpu.PrefetchScalarGridSpec(
            num_scalar_prefetch=0,
            grid=(n_splits, num_i),
            in_specs=[
                pl.BlockSpec((block_rows, _LANE), in_idx),
                pl.BlockSpec((block_rows, _LANE), in_idx),
            ],
            out_specs=[out_spec, out_spec],
        ),
        compiler_params=pltpu.CompilerParams(
            # TODO(synk): on v7x verify the leading axis actually shards both
            # TensorCores; switch to pltpu.CORE_PARALLEL if it does not.
            dimension_semantics=("parallel", "arbitrary")),
    )(pred2d, gt2d)

    loss_sum = jnp.sum(loss_p)
    num_pos = jnp.sum(npos_p)
    # pos_sum == 0 whenever num_pos == 0, so this single expression matches
    # both reference branches (`-neg` vs `-(pos+neg)/num_pos`).
    return -loss_sum / jnp.maximum(num_pos, 1.0)


def _focal_loss_ref(pred, gt):
    """Pure-JAX reference mirroring the PyTorch _neg_loss."""
    pred = pred.astype(jnp.float32)
    gt = gt.astype(jnp.float32)
    pos_inds = (gt == 1.0).astype(jnp.float32)
    neg_inds = (gt < 1.0).astype(jnp.float32)
    neg_weights = (1.0 - gt) ** 4
    pos_loss = jnp.sum(jnp.log(pred) * (1.0 - pred) ** 2 * pos_inds)
    neg_loss = jnp.sum(jnp.log(1.0 - pred) * pred ** 2 * neg_weights * neg_inds)
    num_pos = jnp.sum(pos_inds)
    return jnp.where(num_pos == 0.0,
                     -neg_loss,
                     -(pos_loss + neg_loss) / jnp.maximum(num_pos, 1.0))


if __name__ == "__main__":
    key = jax.random.PRNGKey(0)
    k1, k2, k3 = jax.random.split(key, 3)

    B, C, H, W = 2, 4, 16, 16  # NCHW, matching the PyTorch module's convention

    # pred: sigmoid-like heatmap strictly in (0, 1)
    pred = jax.nn.sigmoid(jax.random.normal(k1, (B, C, H, W), jnp.float32))
    # gt: gaussian-splat style heatmap in [0, 1) with a few exact 1.0 peaks
    gt = jax.random.uniform(k2, (B, C, H, W), jnp.float32, 0.0, 0.95)
    peak_idx = jax.random.randint(k3, (B, C, 2), 0, H)
    for b in range(B):
        for c in range(C):
            gt = gt.at[b, c, peak_idx[b, c, 0], peak_idx[b, c, 1]].set(1.0)

    out = focal_loss(pred, gt)
    jax.block_until_ready(out)
    ref = _focal_loss_ref(pred, gt)
    assert jnp.allclose(out, ref, rtol=1e-5, atol=1e-5), (out, ref)

    # bf16 heatmaps fed as-is (upcast happens inside the kernel).
    out_bf = focal_loss(pred.astype(jnp.bfloat16), gt.astype(jnp.bfloat16))
    jax.block_until_ready(out_bf)
    ref_bf = _focal_loss_ref(pred.astype(jnp.bfloat16), gt.astype(jnp.bfloat16))
    assert jnp.allclose(out_bf, ref_bf, rtol=1e-4, atol=1e-4), (out_bf, ref_bf)

    print("KERNEL_OK")
</pallas_src>

<mosaic_0001>
module attributes {stable_mosaic.version = 11 : i64} {
  func.func @_focal_kernel(%arg0: i32, %arg1: i32, %arg2: memref<16x128xf32, #tpu.memory_space<vmem>>, %arg3: memref<16x128xf32, #tpu.memory_space<vmem>>, %arg4: memref<1x8x128xf32, #tpu.memory_space<vmem>>, %arg5: memref<1x8x128xf32, #tpu.memory_space<vmem>>) attributes {dimension_semantics = [#tpu.dimension_semantics<parallel>, #tpu.dimension_semantics<arbitrary>], iteration_bounds = array<i64: 1, 1>, scalar_prefetch = 0 : i64, scratch_operands = 0 : i64, tpu.core_type = #tpu.core_type<tc>, window_params = [{transform_indices = @transform_0, window_bounds = array<i64: 16, 128>}, {transform_indices = @transform_1, window_bounds = array<i64: 16, 128>}, {transform_indices = @transform_2, window_bounds = array<i64: 1, 8, 128>}, {transform_indices = @transform_3, window_bounds = array<i64: 1, 8, 128>}]} {
    %c0_i32 = arith.constant 0 : i32
    %0 = arith.cmpi eq, %arg1, %c0_i32 : i32
    %1 = arith.extui %0 : i1 to i32
    %c0_i32_0 = arith.constant 0 : i32
    %2 = arith.cmpi ne, %1, %c0_i32_0 : i32
    scf.if %2 {
      %cst_21 = arith.constant 0.000000e+00 : f32
      %45 = vector.broadcast %cst_21 : f32 to vector<8x128xf32>
      %c0_22 = arith.constant 0 : index
      %c0_23 = arith.constant 0 : index
      %c0_24 = arith.constant 0 : index
      %46 = vector.load %arg4[%c0_22, %c0_23, %c0_24] : memref<1x8x128xf32, #tpu.memory_space<vmem>>, vector<1x8x128xf32>
      %47 = vector.shape_cast %46 : vector<1x8x128xf32> to vector<8x128xf32>
      %48 = vector.shape_cast %45 : vector<8x128xf32> to vector<1x8x128xf32>
      tpu.vector_store %arg4[%c0_22, %c0_23, %c0_24], %48 {strides = array<i32>} : memref<1x8x128xf32, #tpu.memory_space<vmem>>, vector<1x8x128xf32>,
      %cst_25 = arith.constant 0.000000e+00 : f32
      %49 = vector.broadcast %cst_25 : f32 to vector<8x128xf32>
      %c0_26 = arith.constant 0 : index
      %c0_27 = arith.constant 0 : index
      %c0_28 = arith.constant 0 : index
      %50 = vector.load %arg5[%c0_26, %c0_27, %c0_28] : memref<1x8x128xf32, #tpu.memory_space<vmem>>, vector<1x8x128xf32>
      %51 = vector.shape_cast %50 : vector<1x8x128xf32> to vector<8x128xf32>
      %52 = vector.shape_cast %49 : vector<8x128xf32> to vector<1x8x128xf32>
      tpu.vector_store %arg5[%c0_26, %c0_27, %c0_28], %52 {strides = array<i32>} : memref<1x8x128xf32, #tpu.memory_space<vmem>>, vector<1x8x128xf32>,
    } else {
    }
    %c0_i32_1 = arith.constant 0 : i32
    %c1_i32 = arith.constant 1 : i32
    %3 = arith.muli %c0_i32_1, %c1_i32 : i32
    %c0_i32_2 = arith.constant 0 : i32
    %4 = arith.addi %c0_i32_2, %3 : i32
    %c16_i32 = arith.constant 16 : i32
    %5 = arith.muli %4, %c16_i32 : i32
    %6 = tpu.assume_multiple %5, 16 : i32
    %7 = arith.index_cast %6 : i32 to index
    %c0 = arith.constant 0 : index
    %8 = vector.load %arg2[%7, %c0] : memref<16x128xf32, #tpu.memory_space<vmem>>, vector<16x128xf32>
    %9 = arith.index_cast %6 : i32 to index
    %c0_3 = arith.constant 0 : index
    %10 = vector.load %arg3[%9, %c0_3] : memref<16x128xf32, #tpu.memory_space<vmem>>, vector<16x128xf32>
    %cst = arith.constant 1.000000e+00 : f32
    %11 = vector.broadcast %cst : f32 to vector<16x128xf32>
    %12 = arith.cmpf oeq, %10, %11 : vector<16x128xf32>
    %13 = arith.extui %12 : vector<16x128xi1> to vector<16x128xi32>
    %14 = arith.sitofp %13 : vector<16x128xi32> to vector<16x128xf32>
    %cst_4 = arith.constant 1.000000e+00 : f32
    %15 = vector.broadcast %cst_4 : f32 to vector<16x128xf32>
    %16 = arith.subf %15, %10 : vector<16x128xf32>
    %cst_5 = arith.constant 1.000000e+00 : f32
    %17 = vector.broadcast %cst_5 : f32 to vector<16x128xf32>
    %18 = arith.subf %17, %8 : vector<16x128xf32>
    %19 = arith.mulf %16, %16 : vector<16x128xf32>
    %20 = arith.mulf %19, %19 : vector<16x128xf32>
    %21 = arith.select %12, %8, %18 : vector<16x128xi1>, vector<16x128xf32>
    %22 = math.log %21 : vector<16x128xf32>
    %23 = arith.mulf %18, %18 : vector<16x128xf32>
    %24 = arith.mulf %23, %14 : vector<16x128xf32>
    %25 = arith.mulf %8, %8 : vector<16x128xf32>
    %26 = arith.mulf %25, %20 : vector<16x128xf32>
    %27 = arith.addf %24, %26 : vector<16x128xf32>
    %28 = arith.mulf %22, %27 : vector<16x128xf32>
    %c0_6 = arith.constant 0 : index
    %c0_7 = arith.constant 0 : index
    %c0_8 = arith.constant 0 : index
    %29 = vector.load %arg4[%c0_6, %c0_7, %c0_8] : memref<1x8x128xf32, #tpu.memory_space<vmem>>, vector<1x8x128xf32>
    %30 = vector.shape_cast %29 : vector<1x8x128xf32> to vector<8x128xf32>
    %31 = vector.shape_cast %28 : vector<16x128xf32> to vector<2x8x128xf32>
    %cst_9 = arith.constant dense<0.000000e+00> : vector<8x128xf32>
    %32 = vector.multi_reduction <add>, %31, %cst_9 [0] : vector<2x8x128xf32> to vector<8x128xf32>
    %33 = arith.addf %30, %32 : vector<8x128xf32>
    %c0_10 = arith.constant 0 : index
    %c0_11 = arith.constant 0 : index
    %c0_12 = arith.constant 0 : index
    %34 = vector.load %arg4[%c0_10, %c0_11, %c0_12] : memref<1x8x128xf32, #tpu.memory_space<vmem>>, vector<1x8x128xf32>
    %35 = vector.shape_cast %34 : vector<1x8x128xf32> to vector<8x128xf32>
    %36 = vector.shape_cast %33 : vector<8x128xf32> to vector<1x8x128xf32>
    tpu.vector_store %arg4[%c0_10, %c0_11, %c0_12], %36 {strides = array<i32>} : memref<1x8x128xf32, #tpu.memory_space<vmem>>, vector<1x8x128xf32>,
    %c0_13 = arith.constant 0 : index
    %c0_14 = arith.constant 0 : index
    %c0_15 = arith.constant 0 : index
    %37 = vector.load %arg5[%c0_13, %c0_14, %c0_15] : memref<1x8x128xf32, #tpu.memory_space<vmem>>, vector<1x8x128xf32>
    %38 = vector.shape_cast %37 : vector<1x8x128xf32> to vector<8x128xf32>
    %39 = vector.shape_cast %14 : vector<16x128xf32> to vector<2x8x128xf32>
    %cst_16 = arith.constant dense<0.000000e+00> : vector<8x128xf32>
    %40 = vector.multi_reduction <add>, %39, %cst_16 [0] : vector<2x8x128xf32> to vector<8x128xf32>
    %41 = arith.addf %38, %40 : vector<8x128xf32>
    %c0_17 = arith.constant 0 : index
    %c0_18 = arith.constant 0 : index
    %c0_19 = arith.constant 0 : index
    %42 = vector.load %arg5[%c0_17, %c0_18, %c0_19] : memref<1x8x128xf32, #tpu.memory_space<vmem>>, vector<1x8x128xf32>
    %43 = vector.shape_cast %42 : vector<1x8x128xf32> to vector<8x128xf32>
    %44 = vector.shape_cast %41 : vector<8x128xf32> to vector<1x8x128xf32>
    tpu.vector_store %arg5[%c0_17, %c0_18, %c0_19], %44 {strides = array<i32>} : memref<1x8x128xf32, #tpu.memory_space<vmem>>, vector<1x8x128xf32>,
    %c1_i32_20 = arith.constant 1 : i32
    return
  }
  func.func @transform_0(%arg0: i32, %arg1: i32) -> (i32, i32) {
    %c1_i32 = arith.constant 1 : i32
    %0 = arith.muli %arg0, %c1_i32 : i32
    %1 = arith.addi %0, %arg1 : i32
    %c0_i32 = arith.constant 0 : i32
    %c0_i32_0 = arith.constant 0 : i32
    return %1, %c0_i32 : i32, i32
  }
  func.func @transform_1(%arg0: i32, %arg1: i32) -> (i32, i32) {
    %c1_i32 = arith.constant 1 : i32
    %0 = arith.muli %arg0, %c1_i32 : i32
    %1 = arith.addi %0, %arg1 : i32
    %c0_i32 = arith.constant 0 : i32
    %c0_i32_0 = arith.constant 0 : i32
    return %1, %c0_i32 : i32, i32
  }
  func.func @transform_2(%arg0: i32, %arg1: i32) -> (i32, i32, i32) {
    %c0_i32 = arith.constant 0 : i32
    %c0_i32_0 = arith.constant 0 : i32
    %c0_i32_1 = arith.constant 0 : i32
    return %arg0, %c0_i32, %c0_i32_0 : i32, i32, i32
  }
  func.func @transform_3(%arg0: i32, %arg1: i32) -> (i32, i32, i32) {
    %c0_i32 = arith.constant 0 : i32
    %c0_i32_0 = arith.constant 0 : i32
    %c0_i32_1 = arith.constant 0 : i32
    return %arg0, %c0_i32, %c0_i32_0 : i32, i32, i32
  }
}

</mosaic_0001>

<bundles_post_ra>
// kernel: tpu_custom_call.1
= control target key start
LH: loop header
LB: loop body
LE: loop exit
PB: predicated region body
PF: predicated region fallthrough
CT: control target
= control target key end

     0   :  { %9 = vsyncpa [#allocation3], 0  ;;  %s319_s0 = inlined_call_operand.hbm [shape: f32[16,128], index: 0, kind: input, shape index: {}]   ;;  %s320_s1 = inlined_call_operand.hbm [shape: f32[16,128], index: 1, kind: input, shape index: {}]   ;;  %s321_s2 = inlined_call_operand.hbm [shape: f32[1,8,128], index: 2, kind: output, shape index: {0}]   ;;  %s322_s3 = inlined_call_operand.hbm [shape: f32[1,8,128], index: 3, kind: output, shape index: {1}]  }
   0x1   :  { %10 = vsyncpa [#allocation6], 0 }
   0x2   :  { %11 = vsyncpa [#allocation4], 0 }
   0x3   :  { %12 = vsyncpa [#allocation9], 0  ;;  %s244_s12 = smov [#allocation2]   ;;  %s148_s16 = scalar_lea.hbm %s319_s0, 256 }
   0x4   :  { %s22_s13 = sshll.u32 %s244_s12, 4  ;;  %p149_p0 = scmp.ne.s32.totalorder %s319_s0, %s148_s16  ;;  %s23_s13 = int_to_ptr.vmem [resolvable:$true] %s22_s13 }
   0x5   :  { %p152_p1 = scmp.lt.u32.totalorder %s148_s16, %s319_s0 }
   0x7   :  { %p154_p2 = pnand %p152_p1, %p149_p0 }
   0x9   :  { %157 = shalt.err (!%p154_p2)
}
   0xa   :  { %s158_s21 = scalar_lea.vmem %s23_s13, 256  ;;  %p163_p4 = scmp.lt.s32.totalorder %s23_s13, %s23_s13 }
   0xb   :  { %p159_p3 = scmp.ne.s32.totalorder %s23_s13, %s158_s21  ;;  %p164_p5 = scmp.lt.s32.totalorder %s158_s21, %s158_s21 }
   0xd   :  { %p165_p6 = por %p164_p5, %p163_p4 }
   0xf   :  { %p166_p7 = pnand %p165_p6, %p159_p3 }
  0x11   :  { %169 = shalt.err (!%p166_p7)
}
  0x12   :  { %s245_s22 = smov 128   ;;  %s246_s23 = smov 8  }
  0x13   :  { %28 = dma.hbm_to_vmem [thread:$0]  %s319_s0, 256, %s23_s13, [#allocation3], %s245_s22, %s245_s22, %s246_s23  }
  0x14   :  { %s247_s26 = smov [#allocation5]   ;;  %s170_s30 = scalar_lea.hbm %s320_s1, 256 }
  0x15   :  { %s38_s27 = sshll.u32 %s247_s26, 4  ;;  %p171_p8 = scmp.ne.s32.totalorder %s320_s1, %s170_s30  ;;  %s39_s27 = int_to_ptr.vmem [resolvable:$true] %s38_s27 }
  0x16   :  { %p174_p9 = scmp.lt.u32.totalorder %s170_s30, %s320_s1 }
  0x18   :  { %p176_p10 = pnand %p174_p9, %p171_p8 }
  0x1a   :  { %179 = shalt.err (!%p176_p10)
}
  0x1b   :  { %s180_s8 = scalar_lea.vmem %s39_s27, 256  ;;  %p185_p12 = scmp.lt.s32.totalorder %s39_s27, %s39_s27 }
  0x1c   :  { %p181_p11 = scmp.ne.s32.totalorder %s39_s27, %s180_s8  ;;  %p186_p13 = scmp.lt.s32.totalorder %s180_s8, %s180_s8 }
  0x1e   :  { %p187_p0 = por %p186_p13, %p185_p12 }
  0x20   :  { %p188_p1 = pnand %p187_p0, %p181_p11 }
  0x22   :  { %191 = shalt.err (!%p188_p1)
}
  0x23   :  { %44 = dma.hbm_to_vmem [thread:$0]  %s320_s1, 256, %s39_s27, [#allocation6], %s245_s22, %s245_s22, %s246_s23  }
  0x24   :  { %236 = dma.done.wait [#allocation3], 256  }
  0x25   :  { %237 = vsyncadd [#allocation3], 4294967040 }
  0x26   :  { %238 = dma.done.wait [#allocation6], 256  }
  0x27   :  { %239 = vsyncadd [#allocation6], 4294967040  ;;  %v61_v0 = vld [vmem:[#allocation2] sm:$0xff]  ;;  %v62_v1 = vld [vmem:[#allocation2 + $0x8] sm:$0xff]  ;;  %v248_v8 = vmov 0.0   ;;  %s249_s1 = smov [#allocation8]  }
  0x28   :  { %v63_v2 = vld [vmem:[#allocation5] sm:$0xff]  ;;  %v64_v3 = vld [vmem:[#allocation5 + $0x8] sm:$0xff]  ;;  %v73_v5 = vsub.f32 1.0, %v61_v0  ;;  %v74_v6 = vsub.f32 1.0, %v62_v1  ;;  %v89_v15 = vmul.f32 %v61_v0, %v61_v0  ;;  %s121_s10 = sshll.u32 %s249_s1, 4  ;;  %v90_v21 = vmul.f32 %v62_v1, %v62_v1  ;;  %s122_s10 = int_to_ptr.vmem [resolvable:$true] %s121_s10 }
  0x29   :  { %vm65_vm0 = vcmp.eq.f32.partialorder %v63_v2, 1.0  ;;  %v71_v4 = vsub.f32 1.0, %v63_v2  ;;  %vm66_vm1 = vcmp.eq.f32.partialorder %v64_v3, 1.0  ;;  %v72_v7 = vsub.f32 1.0, %v64_v3  ;;  %s192_s11 = scalar_lea.vmem %s122_s10, 128  ;;  %p197_p3 = scmp.lt.s32.totalorder %s122_s10, %s122_s10 }
  0x2a   :  { %v135_v9 = vsel %vm65_vm0, 1.0, %v248_v8  ;;  %v79_v11 = vsel %vm65_vm0, %v61_v0, %v73_v5  ;;  %v80_v12 = vsel %vm66_vm1, %v62_v1, %v74_v6  ;;  %v136_v13 = vsel %vm66_vm1, 1.0, %v248_v8  ;;  %p193_p2 = scmp.ne.s32.totalorder %s122_s10, %s192_s11  ;;  %p198_p4 = scmp.lt.s32.totalorder %s192_s11, %s192_s11 }
  0x2b   :  { %v75_v10 = vmul.f32 %v71_v4, %v71_v4  ;;  %v76_v14 = vmul.f32 %v72_v7, %v72_v7  ;;  %144 = vlog2.f32 %v79_v11  ;;  %v85_v17 = vmul.f32 %v73_v5, %v73_v5 }
  0x2c   :  { %146 = vlog2.f32 %v80_v12  ;;  %v102_v18 = vadd.f32 %v136_v13, %v135_v9  ;;  %v86_v20 = vmul.f32 %v74_v6, %v74_v6  ;;  %p199_p5 = por %p198_p4, %p197_p3 }
  0x2d   :  { %v77_v16 = vmul.f32 %v75_v10, %v75_v10  ;;  %v78_v19 = vmul.f32 %v76_v14, %v76_v14  ;;  %v87_v22 = vmul.f32 %v135_v9, %v85_v17 }
  0x2e   :  { %104 = vst [vmem:[#allocation8] sm:$0xff] %v102_v18  ;;  %v88_v24 = vmul.f32 %v136_v13, %v86_v20  ;;  %p200_p6 = pnand %p199_p5, %p193_p2 }
  0x2f   :  { %v91_v23 = vmul.f32 %v89_v15, %v77_v16  ;;  %v92_v25 = vmul.f32 %v90_v21, %v78_v19 }
  0x30   :  { %203 = shalt.err (!%p200_p6)
}
  0x31   :  { %s204_s14 = scalar_lea.hbm %s322_s3, 128 }
  0x32   :  { %p205_p7 = scmp.ne.s32.totalorder %s322_s3, %s204_s14  ;;  %p208_p8 = scmp.lt.u32.totalorder %s204_s14, %s322_s3 }
  0x34   :  { %p210_p9 = pnand %p208_p8, %p205_p7 }
  0x36   :  { %213 = shalt.err (!%p210_p9)
}
  0x37   :  { %124 = dma.vmem_to_hbm [thread:$0]  %s122_s10, 128, %s322_s3, [#allocation9]   ;;  %v93_v26 = vadd.f32 %v91_v23, %v87_v22  ;;  %v145_v27 = vpop.eup %144  ;;  %v94_v28 = vadd.f32 %v92_v25, %v88_v24 }
  0x38   :  { %v147_v29 = vpop.eup %146  ;;  %v82_v30 = vmul.f32 0.6931472, %v145_v27  ;;  %s250_s21 = smov [#allocation7]  }
  0x39   :  { %v84_v31 = vmul.f32 0.6931472, %v147_v29  ;;  %s111_s22 = sshll.u32 %s250_s21, 4  ;;  %s112_s22 = int_to_ptr.vmem [resolvable:$true] %s111_s22 }
  0x3a   :  { %v95_v32 = vmul.f32 %v93_v26, %v82_v30  ;;  %s214_s23 = scalar_lea.vmem %s112_s22, 128  ;;  %p219_p11 = scmp.lt.s32.totalorder %s112_s22, %s112_s22 }
  0x3b   :  { %v96_v33 = vmul.f32 %v94_v28, %v84_v31  ;;  %p215_p10 = scmp.ne.s32.totalorder %s112_s22, %s214_s23  ;;  %p220_p12 = scmp.lt.s32.totalorder %s214_s23, %s214_s23 }
  0x3d   :  { %v98_v34 = vadd.f32 %v96_v33, %v95_v32  ;;  %p221_p13 = por %p220_p12, %p219_p11 }
  0x3f   :  { %100 = vst [vmem:[#allocation7] sm:$0xff] %v98_v34  ;;  %p222_p0 = pnand %p221_p13, %p215_p10 }
  0x41   :  { %225 = shalt.err (!%p222_p0)
}
  0x42   :  { %s226_s25 = scalar_lea.hbm %s321_s2, 128 }
  0x43   :  { %p227_p1 = scmp.ne.s32.totalorder %s321_s2, %s226_s25  ;;  %p230_p2 = scmp.lt.u32.totalorder %s226_s25, %s321_s2 }
  0x45   :  { %p232_p3 = pnand %p230_p2, %p227_p1 }
  0x47   :  { %235 = shalt.err (!%p232_p3)
}
  0x48   :  { %114 = dma.vmem_to_hbm [thread:$0]  %s112_s22, 128, %s321_s2, [#allocation4]  }
  0x49   :  { %240 = dma.done.wait [#allocation4], 128  }
  0x4a   :  { %241 = vsyncadd [#allocation4], 4294967168 }
  0x4b   :  { %242 = dma.done.wait [#allocation9], 128  }
  0x4c   :  { %243 = vsyncadd [#allocation9], 4294967168 }
  0x4d   :  { %131 = vsyncpa [#allocation3], 1 }
  0x4e   :  { %132 = vsyncpa [#allocation6], 1 }
  0x4f   :  { %133 = vsyncpa [#allocation4], 1 }
  0x50   :  { %134 = vsyncpa [#allocation9], 1 }

</bundles_post_ra>
